<compile_context>
chip_gen: v7x
topology: tpu7x:2x2x1
jax: 0.10.0
libtpu: 0.0.40
codegen_flags: <defaults>
</compile_context>

<pallas_src>
import math
import functools

import jax
import jax.numpy as jnp
from jax.experimental import pallas as pl
from jax.experimental.pallas import tpu as pltpu


def _vmem_capacity_bytes():
    try:
        return int(pltpu.get_tpu_info().vmem_capacity_bytes)
    except Exception:
        return 64 * 1024 * 1024          # conservative fallback (v7x per-core)


def _resblock_kernel(*refs, kernel_size, dilation, pad, halo_off, TT, C,
                     use_tap_concat):
    """One (C, TT) time tile of one batch element.

    refs (pad > 0) : x_ref (C,TT), halo_ref (C,2*pad), w_ref (2C,K*C),
                     b_ref (2C,1), out_ref (C,TT), skip_ref (C,TT),
                     xh_ref (C, halo_off+TT+pad) bf16 scratch
    refs (pad == 0): x_ref, w_ref, b_ref, out_ref, skip_ref
    """
    if pad > 0:
        x_ref, halo_ref, w_ref, b_ref, out_ref, skip_ref, xh_ref = refs
    else:
        x_ref, w_ref, b_ref, out_ref, skip_ref = refs

    xc = x_ref[...]                                    # (C, TT), input dtype
    xc_bf = xc.astype(jnp.bfloat16)                    # MXU operand only

    if pad > 0:
        halo = halo_ref[...].astype(jnp.bfloat16)      # (C, 2*pad) [left|right]
        # Stitch [left | centre | right] into the scratch; halo_off is
        # 128-aligned so the big centre store is a lane-dense, unmasked vst.
        xh_ref[:, halo_off - pad:halo_off] = halo[:, :pad]
        xh_ref[:, halo_off:halo_off + TT] = xc_bf
        xh_ref[:, halo_off + TT:halo_off + TT + pad] = halo[:, pad:]
        xh = xh_ref[...]
        windows = [xh[:, halo_off - pad + k * dilation:
                      halo_off - pad + k * dilation + TT]
                   for k in range(kernel_size)]        # K x (C, TT) bf16
    else:
        windows = [xc_bf]                              # kernel_size == 1

    w = w_ref[...]                                     # (2C, K*C) bf16
    if use_tap_concat and len(windows) > 1:
        # Single MXU stage with a K*C-deep contraction (fills the MXU).
        x_taps = jnp.concatenate(windows, axis=0)      # (K*C, TT) bf16
        os = jnp.dot(w, x_taps,
                     preferred_element_type=jnp.float32) + b_ref[...]
    else:
        # K accumulated dots; accumulator initialised with the fused bias.
        os = jnp.broadcast_to(b_ref[...], (2 * C, TT))
        for k, win in enumerate(windows):
            os = os + jnp.dot(w[:, k * C:(k + 1) * C], win,
                              preferred_element_type=jnp.float32)

    residual = xc.astype(jnp.float32)
    out_ref[...] = ((os[:C] + residual) * jnp.float32(math.sqrt(0.5))
                    ).astype(out_ref.dtype)
    skip_ref[...] = os[C:].astype(skip_ref.dtype)


def _pick_time_tile(T, C, pad, kernel_size, requested=None):
    """Returns (TT, Tp): tile size and the (possibly padded-up) total length."""
    if requested is not None:
        TT = int(requested)
        Tp = -(-T // TT) * TT
        if Tp // TT > 1 and TT < pad:
            raise ValueError(f"time_tile={TT} must be >= conv halo pad={pad}")
        return TT, Tp
    # Rough per-time-sample VMEM footprint: double-buffered in/out tiles,
    # bf16 halo scratch + tap stack, f32 (2C, TT) result.
    budget = int(0.4 * _vmem_capacity_bytes())
    per_t = 4 * C * (kernel_size + 12)
    cap = (budget // per_t) // 128 * 128
    cap = max(128, min(2048, cap))
    if T <= cap:
        return T, T                                    # single tile
    for tt in range(cap, 127, -128):                   # largest 128-mult divisor
        if T % tt == 0 and tt >= pad:
            return tt, T
    TT = max(cap, -(-pad // 128) * 128)                # no divisor: pad T up
    return TT, -(-T // TT) * TT


def wavenet_resblock(x, params, *, kernel_size, dilation, time_tile=None):
    """x: (B, C, T). params: PyTorch-layout conv/out/skip weights & biases."""
    if kernel_size % 2 == 0:
        # PyTorch Conv1d with padding=(K-1)//2*d only preserves length for odd K.
        raise ValueError("wavenet_resblock requires an odd kernel_size")
    B, C, T = x.shape
    K = kernel_size
    pad = (K - 1) // 2 * dilation

    TT, Tp = _pick_time_tile(T, C, pad, K, time_tile)
    nT = Tp // TT
    x_in = x if Tp == T else jnp.pad(x, ((0, 0), (0, 0), (0, Tp - T)))

    # ---- Host-side weight fusion (exact in f32; dropout is identity). -----
    w_os = jnp.concatenate([params["out_w"][:, :, 0], params["skip_w"][:, :, 0]],
                           axis=0).astype(jnp.float32)              # (2C, C)
    w_conv = params["conv_w"].astype(jnp.float32)                   # (C, C, K)
    w_fused = jnp.concatenate([w_os @ w_conv[:, :, k] for k in range(K)],
                              axis=1).astype(jnp.bfloat16)          # (2C, K*C)
    b_fused = (w_os @ params["conv_b"].astype(jnp.float32)
               + jnp.concatenate([params["out_b"], params["skip_b"]]
                                 ).astype(jnp.float32)).reshape(2 * C, 1)

    # ---- Halo side input: left/right pad columns of every tile. -----------
    operands = [x_in]
    in_specs = [pl.BlockSpec((None, C, TT), lambda b, j: (b, 0, j))]
    scratch_shapes = []
    H = 0
    if pad > 0:
        zpad = jnp.zeros((B, C, pad), x_in.dtype)
        lefts = [zpad] + [x_in[:, :, j * TT - pad:j * TT] for j in range(1, nT)]
        rights = ([x_in[:, :, (j + 1) * TT:(j + 1) * TT + pad]
                   for j in range(nT - 1)] + [zpad])
        halos = jnp.stack([jnp.concatenate([lefts[j], rights[j]], axis=-1)
                           for j in range(nT)], axis=1)   # (B, nT, C, 2*pad)
        operands.append(halos)
        in_specs.append(pl.BlockSpec((None, None, C, 2 * pad),
                                     lambda b, j: (b, j, 0, 0)))
        H = -(-pad // 128) * 128                          # 128-aligned offset
        scratch_shapes = [pltpu.VMEM((C, H + TT + pad), jnp.bfloat16)]

    operands += [w_fused, b_fused]
    in_specs += [pl.BlockSpec((2 * C, K * C), lambda b, j: (0, 0)),
                 pl.BlockSpec((2 * C, 1), lambda b, j: (0, 0))]

    use_tap_concat = (C % 16 == 0)   # aligned sublane stack -> one big matmul
    kernel = functools.partial(_resblock_kernel, kernel_size=K,
                               dilation=dilation, pad=pad, halo_off=H, TT=TT,
                               C=C, use_tap_concat=use_tap_concat)

    vmem_limit = min(48 * 1024 * 1024, int(0.62 * _vmem_capacity_bytes()))

    out, skip = pl.pallas_call(
        kernel,
        out_shape=(jax.ShapeDtypeStruct((B, C, Tp), x.dtype),
                   jax.ShapeDtypeStruct((B, C, Tp), x.dtype)),
        grid_spec=pltpu.PrefetchScalarGridSpec(
            num_scalar_prefetch=0,
            grid=(B, nT),
            in_specs=in_specs,
            out_specs=[pl.BlockSpec((None, C, TT), lambda b, j: (b, 0, j)),
                       pl.BlockSpec((None, C, TT), lambda b, j: (b, 0, j))],
            scratch_shapes=scratch_shapes),
        compiler_params=pltpu.CompilerParams(
            dimension_semantics=("parallel", "parallel"),
            vmem_limit_bytes=vmem_limit),
    )(*operands)

    if Tp != T:
        out, skip = out[:, :, :T], skip[:, :, :T]
    return out, skip


def reference(x, params, *, kernel_size, dilation):
    """Pure-JAX f32 reference of the PyTorch forward (dropout = identity)."""
    pad = (kernel_size - 1) // 2 * dilation
    conv = jax.lax.conv_general_dilated(
        x, params["conv_w"], window_strides=(1,), padding=[(pad, pad)],
        rhs_dilation=(dilation,),
        dimension_numbers=("NCH", "OIH", "NCH")) + params["conv_b"][None, :, None]
    skip = jnp.einsum("oi,bit->bot", params["skip_w"][:, :, 0], conv) \
        + params["skip_b"][None, :, None]
    out = jnp.einsum("oi,bit->bot", params["out_w"][:, :, 0], conv) \
        + params["out_b"][None, :, None]
    out = (out + x) * math.sqrt(0.5)
    return out, skip


if __name__ == "__main__":
    B, C, T = 2, 4, 16
    kernel_size, dilation = 3, 2

    key = jax.random.PRNGKey(0)
    keys = jax.random.split(key, 7)
    x = jax.random.normal(keys[0], (B, C, T), dtype=jnp.float32)

    # Deterministic parameter init (shapes per nn.Conv1d in __init__)
    scale = 1.0 / math.sqrt(C * kernel_size)
    params = {
        "conv_w": jax.random.uniform(keys[1], (C, C, kernel_size), jnp.float32, -scale, scale),
        "conv_b": jax.random.uniform(keys[2], (C,), jnp.float32, -scale, scale),
        "out_w": jax.random.uniform(keys[3], (C, C, 1), jnp.float32, -0.5, 0.5),
        "out_b": jax.random.uniform(keys[4], (C,), jnp.float32, -0.5, 0.5),
        "skip_w": jax.random.uniform(keys[5], (C, C, 1), jnp.float32, -0.5, 0.5),
        "skip_b": jax.random.uniform(keys[6], (C,), jnp.float32, -0.5, 0.5),
    }

    out, skip = wavenet_resblock(x, params, kernel_size=kernel_size, dilation=dilation)
    jax.block_until_ready((out, skip))

    # MXU operands are bf16 (f32 accumulation + f32 host-side weight fusion),
    # so compare against the f32 reference with a bf16-operand-rounding margin.
    out_ref, skip_ref = reference(x, params, kernel_size=kernel_size, dilation=dilation)
    assert jnp.allclose(out, out_ref, atol=5e-2, rtol=5e-2), "out mismatch"
    assert jnp.allclose(skip, skip_ref, atol=5e-2, rtol=5e-2), "skip mismatch"

    print("KERNEL_OK")
</pallas_src>

<mosaic_0001>
module attributes {stable_mosaic.version = 11 : i64} {
  func.func @_resblock_kernel(%arg0: i32, %arg1: i32, %arg2: memref<1x4x16xf32, #tpu.memory_space<vmem>>, %arg3: memref<1x1x4x4xf32, #tpu.memory_space<vmem>>, %arg4: memref<8x12xbf16, #tpu.memory_space<vmem>>, %arg5: memref<8x1xf32, #tpu.memory_space<vmem>>, %arg6: memref<1x4x16xf32, #tpu.memory_space<vmem>>, %arg7: memref<1x4x16xf32, #tpu.memory_space<vmem>>, %arg8: memref<4x146xbf16, #tpu.memory_space<vmem>>) attributes {dimension_semantics = [#tpu.dimension_semantics<parallel>, #tpu.dimension_semantics<parallel>], iteration_bounds = array<i64: 2, 1>, scalar_prefetch = 0 : i64, scratch_operands = 1 : i64, tpu.core_type = #tpu.core_type<tc>, window_params = [{transform_indices = @transform_0, window_bounds = array<i64: 1, 4, 16>}, {transform_indices = @transform_1, window_bounds = array<i64: 1, 1, 4, 4>}, {pipeline_mode = #tpu.pipeline_mode<synchronous>, transform_indices = @transform_2, window_bounds = array<i64: 8, 12>}, {pipeline_mode = #tpu.pipeline_mode<synchronous>, transform_indices = @transform_3, window_bounds = array<i64: 8, 1>}, {transform_indices = @transform_4, window_bounds = array<i64: 1, 4, 16>}, {transform_indices = @transform_5, window_bounds = array<i64: 1, 4, 16>}]} {
    %c0 = arith.constant 0 : index
    %c0_0 = arith.constant 0 : index
    %c0_1 = arith.constant 0 : index
    %0 = vector.load %arg2[%c0, %c0_0, %c0_1] : memref<1x4x16xf32, #tpu.memory_space<vmem>>, vector<1x4x16xf32>
    %1 = vector.shape_cast %0 : vector<1x4x16xf32> to vector<4x16xf32>
    %2 = arith.truncf %1 : vector<4x16xf32> to vector<4x16xbf16>
    %c0_2 = arith.constant 0 : index
    %c0_3 = arith.constant 0 : index
    %c0_4 = arith.constant 0 : index
    %c0_5 = arith.constant 0 : index
    %3 = vector.load %arg3[%c0_2, %c0_3, %c0_4, %c0_5] : memref<1x1x4x4xf32, #tpu.memory_space<vmem>>, vector<1x1x4x4xf32>
    %4 = vector.shape_cast %3 : vector<1x1x4x4xf32> to vector<4x4xf32>
    %5 = arith.truncf %4 : vector<4x4xf32> to vector<4x4xbf16>
    %6 = vector.extract_strided_slice %5 {offsets = [0, 0], sizes = [4, 2], strides = [1, 1]} : vector<4x4xbf16> to vector<4x2xbf16>
    %c0_6 = arith.constant 0 : index
    %c126 = arith.constant 126 : index
    %7 = vector.load %arg8[%c0_6, %c126] : memref<4x146xbf16, #tpu.memory_space<vmem>>, vector<4x2xbf16>
    tpu.vector_store %arg8[%c0_6, %c126], %6 {strides = array<i32>} : memref<4x146xbf16, #tpu.memory_space<vmem>>, vector<4x2xbf16>,
    %c0_7 = arith.constant 0 : index
    %c128 = arith.constant 128 : index
    %8 = vector.load %arg8[%c0_7, %c128] : memref<4x146xbf16, #tpu.memory_space<vmem>>, vector<4x16xbf16>
    tpu.vector_store %arg8[%c0_7, %c128], %2 {strides = array<i32>} : memref<4x146xbf16, #tpu.memory_space<vmem>>, vector<4x16xbf16>,
    %9 = vector.extract_strided_slice %5 {offsets = [0, 2], sizes = [4, 2], strides = [1, 1]} : vector<4x4xbf16> to vector<4x2xbf16>
    %c0_8 = arith.constant 0 : index
    %c144 = arith.constant 144 : index
    %10 = vector.load %arg8[%c0_8, %c144] : memref<4x146xbf16, #tpu.memory_space<vmem>>, vector<4x2xbf16>
    tpu.vector_store %arg8[%c0_8, %c144], %9 {strides = array<i32>} : memref<4x146xbf16, #tpu.memory_space<vmem>>, vector<4x2xbf16>,
    %c0_9 = arith.constant 0 : index
    %c0_10 = arith.constant 0 : index
    %11 = vector.load %arg8[%c0_9, %c0_10] : memref<4x146xbf16, #tpu.memory_space<vmem>>, vector<4x146xbf16>
    %12 = vector.extract_strided_slice %11 {offsets = [0, 126], sizes = [4, 16], strides = [1, 1]} : vector<4x146xbf16> to vector<4x16xbf16>
    %13 = vector.extract_strided_slice %11 {offsets = [0, 128], sizes = [4, 16], strides = [1, 1]} : vector<4x146xbf16> to vector<4x16xbf16>
    %14 = vector.extract_strided_slice %11 {offsets = [0, 130], sizes = [4, 16], strides = [1, 1]} : vector<4x146xbf16> to vector<4x16xbf16>
    %c0_11 = arith.constant 0 : index
    %c0_12 = arith.constant 0 : index
    %15 = vector.load %arg4[%c0_11, %c0_12] : memref<8x12xbf16, #tpu.memory_space<vmem>>, vector<8x12xbf16>
    %c0_13 = arith.constant 0 : index
    %c0_14 = arith.constant 0 : index
    %16 = vector.load %arg5[%c0_13, %c0_14] : memref<8x1xf32, #tpu.memory_space<vmem>>, vector<8x1xf32>
    %17 = vector.shape_cast %16 : vector<8x1xf32> to vector<8x1xf32>
    %18 = vector.broadcast %17 : vector<8x1xf32> to vector<8x16xf32>
    %19 = vector.extract_strided_slice %15 {offsets = [0, 0], sizes = [8, 4], strides = [1, 1]} : vector<8x12xbf16> to vector<8x4xbf16>
    %cst = arith.constant dense<0.000000e+00> : vector<8x16xf32>
    %20 = tpu.matmul %19, %12, %cst {dimension_numbers = #tpu.dot_dimension_numbers<[1], [0], [0], [1], [0, 0, 1, 1], [], []>} : vector<8x4xbf16>, vector<4x16xbf16>, vector<8x16xf32> -> vector<8x16xf32>
    %21 = arith.addf %18, %20 : vector<8x16xf32>
    %22 = vector.extract_strided_slice %15 {offsets = [0, 4], sizes = [8, 4], strides = [1, 1]} : vector<8x12xbf16> to vector<8x4xbf16>
    %cst_15 = arith.constant dense<0.000000e+00> : vector<8x16xf32>
    %23 = tpu.matmul %22, %13, %cst_15 {dimension_numbers = #tpu.dot_dimension_numbers<[1], [0], [0], [1], [0, 0, 1, 1], [], []>} : vector<8x4xbf16>, vector<4x16xbf16>, vector<8x16xf32> -> vector<8x16xf32>
    %24 = arith.addf %21, %23 : vector<8x16xf32>
    %25 = vector.extract_strided_slice %15 {offsets = [0, 8], sizes = [8, 4], strides = [1, 1]} : vector<8x12xbf16> to vector<8x4xbf16>
    %cst_16 = arith.constant dense<0.000000e+00> : vector<8x16xf32>
    %26 = tpu.matmul %25, %14, %cst_16 {dimension_numbers = #tpu.dot_dimension_numbers<[1], [0], [0], [1], [0, 0, 1, 1], [], []>} : vector<8x4xbf16>, vector<4x16xbf16>, vector<8x16xf32> -> vector<8x16xf32>
    %27 = arith.addf %24, %26 : vector<8x16xf32>
    %28 = vector.extract_strided_slice %27 {offsets = [0, 0], sizes = [4, 16], strides = [1, 1]} : vector<8x16xf32> to vector<4x16xf32>
    %29 = arith.addf %28, %1 : vector<4x16xf32>
    %cst_17 = arith.constant 0.707106769 : f32
    %30 = vector.broadcast %cst_17 : f32 to vector<4x16xf32>
    %31 = arith.mulf %29, %30 : vector<4x16xf32>
    %c0_18 = arith.constant 0 : index
    %c0_19 = arith.constant 0 : index
    %c0_20 = arith.constant 0 : index
    %32 = vector.load %arg6[%c0_18, %c0_19, %c0_20] : memref<1x4x16xf32, #tpu.memory_space<vmem>>, vector<1x4x16xf32>
    %33 = vector.shape_cast %32 : vector<1x4x16xf32> to vector<4x16xf32>
    %34 = vector.shape_cast %31 : vector<4x16xf32> to vector<1x4x16xf32>
    tpu.vector_store %arg6[%c0_18, %c0_19, %c0_20], %34 {strides = array<i32>} : memref<1x4x16xf32, #tpu.memory_space<vmem>>, vector<1x4x16xf32>,
    %35 = vector.extract_strided_slice %27 {offsets = [4, 0], sizes = [4, 16], strides = [1, 1]} : vector<8x16xf32> to vector<4x16xf32>
    %c0_21 = arith.constant 0 : index
    %c0_22 = arith.constant 0 : index
    %c0_23 = arith.constant 0 : index
    %36 = vector.load %arg7[%c0_21, %c0_22, %c0_23] : memref<1x4x16xf32, #tpu.memory_space<vmem>>, vector<1x4x16xf32>
    %37 = vector.shape_cast %36 : vector<1x4x16xf32> to vector<4x16xf32>
    %38 = vector.shape_cast %35 : vector<4x16xf32> to vector<1x4x16xf32>
    tpu.vector_store %arg7[%c0_21, %c0_22, %c0_23], %38 {strides = array<i32>} : memref<1x4x16xf32, #tpu.memory_space<vmem>>, vector<1x4x16xf32>,
    return
  }
  func.func @transform_0(%arg0: i32, %arg1: i32) -> (i32, i32, i32) {
    %c0_i32 = arith.constant 0 : i32
    %c0_i32_0 = arith.constant 0 : i32
    return %arg0, %c0_i32, %arg1 : i32, i32, i32
  }
  func.func @transform_1(%arg0: i32, %arg1: i32) -> (i32, i32, i32, i32) {
    %c0_i32 = arith.constant 0 : i32
    %c0_i32_0 = arith.constant 0 : i32
    %c0_i32_1 = arith.constant 0 : i32
    return %arg0, %arg1, %c0_i32, %c0_i32_0 : i32, i32, i32, i32
  }
  func.func @transform_2(%arg0: i32, %arg1: i32) -> (i32, i32) {
    %c0_i32 = arith.constant 0 : i32
    %c0_i32_0 = arith.constant 0 : i32
    %c0_i32_1 = arith.constant 0 : i32
    return %c0_i32, %c0_i32_0 : i32, i32
  }
  func.func @transform_3(%arg0: i32, %arg1: i32) -> (i32, i32) {
    %c0_i32 = arith.constant 0 : i32
    %c0_i32_0 = arith.constant 0 : i32
    %c0_i32_1 = arith.constant 0 : i32
    return %c0_i32, %c0_i32_0 : i32, i32
  }
  func.func @transform_4(%arg0: i32, %arg1: i32) -> (i32, i32, i32) {
    %c0_i32 = arith.constant 0 : i32
    %c0_i32_0 = arith.constant 0 : i32
    return %arg0, %c0_i32, %arg1 : i32, i32, i32
  }
  func.func @transform_5(%arg0: i32, %arg1: i32) -> (i32, i32, i32) {
    %c0_i32 = arith.constant 0 : i32
    %c0_i32_0 = arith.constant 0 : i32
    return %arg0, %c0_i32, %arg1 : i32, i32, i32
  }
}

</mosaic_0001>

<bundles_post_ra>
// kernel: tpu_custom_call.1
= control target key start
LH: loop header
LB: loop body
LE: loop exit
PB: predicated region body
PF: predicated region fallthrough
CT: control target
= control target key end

     0   :  { %11 = vsyncpa [#allocation4], 0  ;;  %s1228_s0 = inlined_call_operand.vmem [shape: f32[2,4,16], index: 0, kind: input, shape index: {}]   ;;  %s1229_s1 = inlined_call_operand.hbm [shape: f32[2,1,4,4], index: 1, kind: input, shape index: {}]   ;;  %s1230_s2 = inlined_call_operand.vmem [shape: bf16[8,12], index: 2, kind: input, shape index: {}]   ;;  %s1231_s3 = inlined_call_operand.vmem [shape: f32[8,1], index: 3, kind: input, shape index: {}]   ;;  %s1232_s4 = inlined_call_operand.hbm [shape: f32[2,4,16], index: 4, kind: output, shape index: {0}]   ;;  %s1233_s5 = inlined_call_operand.hbm [shape: f32[2,4,16], index: 5, kind: output, shape index: {1}]  }
   0x1   :  { %13 = vsyncpa [#allocation4 + $0x1], 0 }
   0x2   :  { %14 = vsyncpa [#allocation5], 0 }
   0x3   :  { %16 = vsyncpa [#allocation5 + $0x1], 0 }
   0x4   :  { %17 = vsyncpa [#allocation8], 0 }
   0x5   :  { %19 = vsyncpa [#allocation8 + $0x1], 0  ;;  %s985_s18 = smov 0   ;;  %s987_s19 = smov 0  }
   0x6   :  { %s989_s20 = smov 0   ;;  %s991_s21 = smov 0  }
   0x7   :  { %s993_s22 = smov 0   ;;  %s995_s23 = smov 0  }
   0x8 LB: > { %s666_s24 = sadd.s32 4294967295, %s941_s23   ;;  %s667_s25 = sadd.s32 4294967294, %s941_s23   ;;  %s941_s23 = sphi %s995_s23, %s25_s23   ;;  %s937_s22 = sphi %s993_s22, %s1251_s22   ;;  %s933_s21 = sphi %s991_s21, %s1250_s21   ;;  %s929_s20 = sphi %s989_s20, %s1249_s20   ;;  %s925_s19 = sphi %s987_s19, %s1248_s19   ;;  %s921_s18 = sphi %s985_s18, %s1247_s18  }
   0x9   : > { %s37_s26 = sadd.s32 1, %s937_s22  ;;  %s74_s27 = sadd.s32 1, %s929_s20 }
   0xa   : > { %p39_p0 = scmp.ge.s32.totalorder %s37_s26, 2  ;;  %p81_p1 = scmp.ne.s32.totalorder %s929_s20, %s925_s19 }
   0xb   : > { %p82_p2 = scmp.eq.s32.totalorder %s941_s23, 0  ;;  %p87_p3 = scmp.ne.s32.totalorder %s925_s19, %s921_s18 }
   0xc   : > { %s1253_s26 = smov (%p39_p0, %s37_s26), 0  ;;  %p88_p5 = scmp.eq.s32.totalorder %s666_s24, 0 }
   0xd   : > { %p1026_p4 = por %p82_p2, %p81_p1  ;;  %s69_s29 = ssub.s32 %s937_s22, %s1253_s26 }
   0xe   : > { %p155_p6 = scmp.eq.s32.totalorder %s666_s24, 1  ;;  %p72_p7 = scmp.eq.s32.totalorder %s69_s29, 0 }
   0xf   : > { %p1032_p8 = por %p88_p5, %p87_p3  ;;  %p161_p10 = scmp.eq.s32.totalorder %s667_s25, 1 }
  0x10   : > { %p1036_p9 = por %p155_p6, %p81_p1  ;;  %p735_p13 = scmp.lt.s32.totalorder %s941_s23, 2 }
  0x11   : > { %s1041_s7 = scalar_select %p72_p7, %s929_s20, %s74_s27  }
  0x12   : > { %s1238_s6 = scalar_select %p1036_p9, 1, 0 }
  0x13   : > { %p1043_p11 = por %p161_p10, %p87_p3  ;;  %s225_s9 = sand.u32 1, %s929_s20  }
  0x14   : > { %s670_s10 = sshll.u32 %s225_s9, 2  ;;  %s671_s11 = sshll.u32 %s937_s22, 6 }
  0x15   : > { %s1239_s8 = scalar_select %p1043_p11, 1, 0 }
  0x16   : > { %s1054_s14 = scalar_lea.hbm %s1229_s1, %s671_s11  ;;  %s229_s15 = scalar_lea.vmem [#allocation3], %s670_s10 }
  0x17   : > { %s237_s16 = sshll.u32 %s229_s15, 4  ;;  %p1060_p0 = pnand %p735_p13, %p1026_p4  ;;  %s1056_s16 = int_to_ptr.vmem [resolvable:$true] %s237_s16 }
  0x18   : > { %s226_s24 = scalar_lea.sflag [#allocation4], %s225_s9  ;;  %s797_s25 = scalar_lea.hbm %s1054_s14, 64 }
  0x19   : > { %p798_p3 = scmp.ne.s32.totalorder %s1054_s14, %s797_s25  ;;  %p799_p5 = pneg %p1060_p0 }
  0x1a   : > { %s802_s28 = scalar_lea.hbm %s1229_s1, 128  ;;  %p803_p4 = scmp.lt.u32.totalorder %s1054_s14, %s1229_s1 }
  0x1b   : > { %p800_p6 = pnand %p799_p5, %p798_p3  ;;  %p804_p10 = scmp.lt.u32.totalorder %s802_s28, %s797_s25 }
  0x1c   : > { %p806_p12 = scmp.lt.u32.totalorder %s797_s25, %s1054_s14 }
  0x1d   : > { %p801_p7 = pneg %p800_p6  ;;  %p805_p13 = por %p804_p10, %p803_p4 }
  0x1f   : > { %p807_p1 = por %p806_p12, %p805_p13 }
  0x21   : > { %p808_p2 = pnand %p807_p1, %p801_p7 }
  0x23   : > { %811 = shalt.err (!%p808_p2)
}
  0x24   : > { %s812_s9 = scalar_lea.vmem %s1056_s16, 64  ;;  %s943_s12 = smov [#allocation3]  }
  0x25   : > { %p813_p3 = scmp.ne.s32.totalorder %s1056_s16, %s812_s9  ;;  %s817_s13 = sshll.u32 %s943_s12, 4  ;;  %s818_s13 = int_to_ptr.vmem [resolvable:$false] %s817_s13 }
  0x26   : > { %s819_s15 = scalar_lea.vmem %s818_s13, 128  ;;  %p820_p9 = scmp.lt.s32.totalorder %s1056_s16, %s818_s13 }
  0x27   : > { %p815_p6 = pnand %p813_p3, %p799_p5  ;;  %p821_p4 = scmp.lt.s32.totalorder %s819_s15, %s812_s9 }
  0x29   : > { %p816_p11 = pneg %p815_p6  ;;  %p822_p10 = por %p821_p4, %p820_p9 }
  0x2b   : > { %p823_p12 = pnand %p822_p10, %p816_p11 }
  0x2d   : > { %826 = shalt.err (!%p823_p12)
}
  0x2e   : > { %727 = dma.hbm_to_vmem [thread:$0]  (!%p1060_p0), %s1054_s14, 64, %s1056_s16, %s226_s24  }
  0x2f   : > { %p1241_p1 = scmp.lt.s32.totalorder %s941_s23, 3  ;;  %p1242_p2 = scmp.ge.s32.totalorder %s941_s23, 1 }
  0x31   : > { %p243_p5 = pnand %p1242_p2, %p1241_p1 }
  0x32   : > { %s1096_s25 = sand.u32 (!%p243_p5), 1, %s925_s19  }
  0x33   : > { %246 = sbr.rel (%p243_p5) target bundleno = 571 (0x23b), region = 36  ;;  %s1099_s27 = sshll.u32 (!%p243_p5), %s1096_s25, 2 }
  0x34   : > { %s249_s29 = scalar_lea.sflag (!%p243_p5), [#allocation4], %s1096_s25  ;;  %s252_s17 = scalar_lea.vmem (!%p243_p5), [#allocation3], %s1099_s27 }
  0x3a   : > { %908 = dma.done.wait (%p1032_p8), %s249_s29, 64  }
  0x3b   : > { %910 = vsyncadd (%p1032_p8), %s249_s29, 4294967232  ;;  %v307_v0 = vlaneseq  ;;  %v944_v1 = vmov 1983009808   ;;  %p291_p9 = scmp.lt.s32.totalorder %s933_s21, 1  ;;  %vm316_vm0 = vcmask 123904   ;;  %s945_s9 = smov 124  }
  0x3c   : > { %v305_v2 = vunpack.c.l.s4 %v944_v1  ;;  %v301_v6 = vld [vmem:[%s252_s17] sm:$0xf]  ;;  %v324_v8 = vld [vmem:[%s1230_s2] sm:$0xf]  ;;  %s946_s12 = smov 126   ;;  %v947_v13 = vmov 0.0  }
  0x3d   : > { %v308_v3 = vshrl.u32 %v307_v0, 7  ;;  %s292_s14 = scalar_select %p291_p9, %s933_s21, 1  ;;  %v302_v9 = vpack.c.bf16 %v301_v6, %v301_v6  ;;  %v679_v11 = vcombine.low %v324_v8, %v324_v8  ;;  %700 = vmatprep.subr.bf16.mxu0 %v947_v13  ;;  %694 = vmatprep.subr.bf16.mxu1 %v947_v13  ;;  %vm949_vm1 = vmmov 0   ;;  %v325_v21 = vld [vmem:[%s1231_s3] sm:$0xff] }
  0x3e   : > { %v306_v4 = vunpack.c.0.s8 %v305_v2  ;;  %s948_s13 = smov 14   ;;  %702 = vmatprep.mubr.msk.bf16.mxu0 %vm949_vm1, %v947_v13  ;;  %696 = vmatprep.mubr.msk.bf16.mxu1 %vm949_vm1, %v947_v13  ;;  %vm314_vm2 = vcmask 1042416   ;;  %vm321_vm3 = vcmask 140416   ;;  %v950_v16 = vmov 0   ;;  %s951_s15 = smov 2  }
  0x3f   : > { %s676_s16 = sshll.u32 %s292_s14, 2  ;;  %398 = vrot.lane.b32.xlu1 %v679_v11, %s945_s9  ;;  %795 = vset.pattern.permute.xlu0 %v950_v16  ;;  %vm350_vm4 = vcmask 1041408   ;;  %vm346_vm5 = vcmask 31744   ;;  %s952_s14 = smov 120   ;;  %vm344_vm6 = vcmask 15360   ;;  %vm502_vm7 = vcmask 130052  }
  0x40   : > { %v309_v5 = vsub.s32 %v306_v4, %v308_v3  ;;  %s297_s10 = scalar_lea.vmem %s1228_s0, %s676_s16  ;;  %794 = vset.pattern.permute.xlu1 %v950_v16  ;;  %s684_s16 = sshll.u32 %s933_s21, 6  ;;  %vm500_vm8 = vcmask 125952  }
  0x41   : > { %v1112_v7 = vld [vmem:[%s297_s10] sm:$0xf]  ;;  %s290_s24 = scalar_lea.vmem [#allocation7], %s1099_s27  ;;  %s1138_s11 = scalar_lea.hbm %s1233_s5, %s684_s16 }
  0x42   : > { %v300_v10 = vpack.c.bf16 %v1112_v7, %v1112_v7  ;;  %v310_v12 = vrot.slane %v302_v9, %v309_v5  ;;  %s538_s28 = sshll.u32 %s290_s24, 4  ;;  %s1235_s9 = scalar_lea.vmem [#allocation6], %s1099_s27  ;;  %s1140_s28 = int_to_ptr.vmem [resolvable:$true] %s538_s28 }
  0x43   : > { %p1243_p11 = scmp.ne.s32.totalorder %s1238_s6, 0  ;;  %s953_s29 = smov [#allocation7]  }
  0x44   : > { %317 = vst.msk [vmem:[#allocation2 + $0x2] sm:$0x3] %vm316_vm0, %v300_v10  ;;  %311 = vrot.lane.b32.xlu0 %v310_v12, %s946_s12  ;;  %s831_s17 = sshll.u32 %s953_s29, 4  ;;  %s832_s17 = int_to_ptr.vmem [resolvable:$false] %s831_s17 }
  0x45   : > { %p834_p13 = scmp.lt.s32.totalorder %s1140_s28, %s832_s17 }
  0x48   : > { %318 = vrot.lane.b32.xlu0 %v310_v12, %s948_s13  ;;  %s510_s13 = scalar_lea.sflag [#allocation8], %s1096_s25 }
  0xb1   : > { %v399_v20 = vpop.permute.xlu1 %398 }
  0xb6   : > { %v312_v14 = vpop.permute.xlu0 %311 }
  0xb7   : > { %315 = vst.msk [vmem:[#allocation2] sm:$0x3] %vm314_vm2, %v312_v14 }
  0xba   : > { %v319_v15 = vpop.permute.xlu0 %318 }
  0xbb   : > { %322 = vst.msk [vmem:[#allocation2 + $0x2] sm:$0x3] %vm321_vm3, %v319_v15 }
  0xc2   : > { %v677_v17 = vld.sshfl [vmem:[#allocation2] sm:$0x33 pattern:$0x76325410] }
  0xc3   : > { %340 = vrot.lane.b32.xlu1 %v677_v17, %s951_s15  ;;  %v339_v18 = vcombine.high %v677_v17, %v677_v17 }
  0xc5   : > { %342 = vrot.lane.b32.xlu0 %v339_v18, %s951_s15  ;;  %v404_v19 = vsel %vm350_vm4, %v339_v18, 0  ;;  %s827_s15 = scalar_lea.vmem %s1140_s28, 64 }
  0xc6   : > { %701 = vmatpush3.bf16.msra.mxu0 %v404_v19  ;;  %p828_p8 = scmp.ne.s32.totalorder %s1140_s28, %s827_s15 }
  0xc7   : > { %449 = vrot.lane.b32.xlu1 %v339_v18, %s946_s12  ;;  %706 = vmatprep.subr.bf16.mxu0 %v947_v13  ;;  %s1145_s12 = sshll.u32 %s1235_s9, 4  ;;  %s1178_s12 = int_to_ptr.vmem [resolvable:$true] %s1145_s12 }
  0xc8   : > { %p829_p0 = pnand %p828_p8, %p1243_p11 }
  0xc9   : > { %447 = vrot.lane.b32.xlu0 %v679_v11, %s952_s14  ;;  %703 = vmatmul.mubr.msk.bf16.vlgmr.msra.gmra.mrb[0].mxu0 %vm346_vm5, %v399_v20  ;;  %s833_s14 = scalar_lea.vmem %s832_s17, 128 }
  0xca   : > { %708 = vmatprep.mubr.msk.bf16.mxu0 %vm949_vm1, %v947_v13  ;;  %p830_p7 = pneg %p829_p0  ;;  %p835_p3 = scmp.lt.s32.totalorder %s833_s14, %s827_s15 }
  0xcb   : > { %328 = vperm.xlu1 %794, %v325_v21  }
  0xcc   : > { %p836_p6 = por %p835_p3, %p834_p13 }
  0xce   : > { %p837_p4 = pnand %p836_p6, %p830_p7 }
 0x135   : > { %v341_v22 = vpop.permute.xlu1 %340 }
 0x137   : > { %v343_v23 = vpop.permute.xlu0 %342 }
 0x138   : > { %v345_v24 = vsel %vm344_vm6, %v341_v22, %v343_v23 }
 0x139   : > { %v450_v25 = vpop.permute.xlu1 %449  ;;  %v352_v26 = vsel %vm350_vm4, %v345_v24, 0 }
 0x13a   : > { %v455_v27 = vsel %vm350_vm4, %v450_v25, 0  ;;  %695 = vmatpush3.bf16.msra.mxu1 %v352_v26 }
 0x13b   : > { %707 = vmatpush3.bf16.msra.mxu0 %v455_v27  ;;  %v448_v28 = vpop.permute.xlu0 %447 }
 0x13d   : > { %697 = vmatmul.mubr.msk.bf16.vlgmr.msra.gmra.mrb[0].mxu1 %vm346_vm5, %v324_v8 }
 0x13e   : > { %709 = vmatmul.mubr.msk.bf16.vlgmr.msra.gmra.mrb[0].mxu0 %vm346_vm5, %v448_v28 }
 0x14a   : > { %v329_v29 = vpop.permute.xlu1 %328 }
 0x210   : > { %v388_v30 = vpop.f32.mrb[0].mxu1 }
 0x211   : > { %v394_v31 = vadd.f32 %v388_v30, %v329_v29  ;;  %v491_v32 = vpop.f32.mrb[0].mxu0  ;;  %v698_v33 = vpop.f32.mrb[1].mxu1 }
 0x212   : > { %v710_v34 = vpop.f32.mrb[1].mxu0  ;;  %v391_v35 = vpop.f32.mrb[2].mxu1 }
 0x213   : > { %v713_v36 = vadd.f32 %v491_v32, %v394_v31  ;;  %v494_v37 = vpop.f32.mrb[2].mxu0  ;;  %v699_v38 = vpop.f32.mrb[3].mxu1 }
 0x214   : > { %v711_v39 = vpop.f32.mrb[3].mxu0 }
 0x215   : > { %v498_v40 = vadd.f32 %v713_v36, %v1112_v7  ;;  %503 = vst.msk [vmem:[%s290_s24 - $0x4] sm:$0xf0] %vm502_vm7, %v713_v36 }
 0x216   : > { %840 = shalt.err (!%p837_p4)
}
 0x217   : > { %s841_s24 = scalar_lea.hbm %s1138_s11, 64  ;;  %s845_s29 = scalar_lea.hbm %s1233_s5, 128 }
 0x218   : > { %p842_p10 = scmp.ne.s32.totalorder %s1138_s11, %s841_s24  ;;  %p846_p2 = scmp.lt.u32.totalorder %s1138_s11, %s1233_s5 }
 0x219   : > { %p847_p5 = scmp.lt.u32.totalorder %s845_s29, %s841_s24  ;;  %p849_p8 = scmp.lt.u32.totalorder %s841_s24, %s1138_s11 }
 0x21a   : > { %p843_p12 = pnand %p842_p10, %p1243_p11 }
 0x21b   : > { %p848_p9 = por %p847_p5, %p846_p2 }
 0x21c   : > { %p844_p1 = pneg %p843_p12 }
 0x21d   : > { %p850_p0 = por %p849_p8, %p848_p9 }
 0x21f   : > { %p851_p7 = pnand %p850_p0, %p844_p1 }
 0x221   : > { %854 = shalt.err (!%p851_p7)
}
 0x222   : > { %721 = dma.vmem_to_hbm [thread:$0]  (%p1243_p11), %s1140_s28, 64, %s1138_s11, %s510_s13   ;;  %v499_v41 = vmul.f32 0.70710677, %v498_v40 }
 0x223   : > { %s1175_s14 = scalar_lea.hbm %s1232_s4, %s684_s16  ;;  %s1244_s24 = scalar_lea.vmem [#allocation6], %s1099_s27 }
 0x224   : > { %501 = vst.msk [vmem:[%s1244_s24] sm:$0xf] %vm500_vm8, %v499_v41  ;;  %s505_s10 = scalar_lea.sflag [#allocation5], %s1096_s25  ;;  %s855_s30 = scalar_lea.vmem %s1178_s12, 64 }
 0x225   : > { %p856_p13 = scmp.ne.s32.totalorder %s1178_s12, %s855_s30  ;;  %s954_s21 = smov [#allocation6]  }
 0x226   : > { %s859_s28 = sshll.u32 %s954_s21, 4  ;;  %s860_s28 = int_to_ptr.vmem [resolvable:$false] %s859_s28 }
 0x227   : > { %p857_p3 = pnand %p856_p13, %p1243_p11  ;;  %s861_s11 = scalar_lea.vmem %s860_s28, 128 }
 0x228   : > { %p862_p4 = scmp.lt.s32.totalorder %s1178_s12, %s860_s28  ;;  %p863_p10 = scmp.lt.s32.totalorder %s861_s11, %s855_s30 }
 0x229   : > { %p858_p6 = pneg %p857_p3 }
 0x22a   : > { %p864_p12 = por %p863_p10, %p862_p4 }
 0x22c   : > { %p865_p1 = pnand %p864_p12, %p858_p6 }
 0x22e   : > { %868 = shalt.err (!%p865_p1)
}
 0x22f   : > { %s869_s25 = scalar_lea.hbm %s1175_s14, 64  ;;  %s873_s13 = scalar_lea.hbm %s1232_s4, 128 }
 0x230   : > { %p870_p2 = scmp.ne.s32.totalorder %s1175_s14, %s869_s25  ;;  %p874_p8 = scmp.lt.u32.totalorder %s1175_s14, %s1232_s4 }
 0x231   : > { %p875_p0 = scmp.lt.u32.totalorder %s873_s13, %s869_s25  ;;  %p877_p13 = scmp.lt.u32.totalorder %s869_s25, %s1175_s14 }
 0x232   : > { %p871_p5 = pnand %p870_p2, %p1243_p11 }
 0x233   : > { %p876_p7 = por %p875_p0, %p874_p8 }
 0x234   : > { %p872_p9 = pneg %p871_p5 }
 0x235   : > { %p878_p3 = por %p877_p13, %p876_p7 }
 0x237   : > { %p879_p6 = pnand %p878_p3, %p872_p9 }
 0x239   : > { %882 = shalt.err (!%p879_p6)
}
 0x23a   : > { %720 = dma.vmem_to_hbm [thread:$0]  (%p1243_p11), %s1178_s12, 64, %s1175_s14, %s505_s10  }
 0x23b PF: > { %s550_s9 = sand.u32 1, %s921_s18   ;;  %p1245_p4 = scmp.ne.s32.totalorder %s1239_s8, 0 }
 0x23c   : > { %p1246_p10 = scmp.ge.s32.totalorder %s941_s23, 2  ;;  %s551_s15 = scalar_lea.sflag [#allocation5], %s550_s9 }
 0x23e   : > { %p729_p12 = pnand %p1246_p10, %p1245_p4 }
 0x240   : > { %912 = dma.done.wait (!%p729_p12), %s551_s15, 64  }
 0x241   : > { %914 = vsyncadd (!%p729_p12), %s551_s15, 4294967232  ;;  %s560_s24 = scalar_lea.sflag [#allocation8], %s550_s9 }
 0x242   : > { %916 = dma.done.wait (!%p729_p12), %s560_s24, 64  }
 0x243   : > { %918 = vsyncadd (!%p729_p12), %s560_s24, 4294967232  ;;  %s25_s23 = sadd.s32 1, %s941_s23   ;;  %s1247_s18 = smov %s925_s19 }
 0x244   : > { %p22_p1 = scmp.ge.s32.totalorder %s25_s23, 4   ;;  %s1248_s19 = smov %s929_s20 }
 0x245   : > { %s1249_s20 = smov %s1041_s7  ;;  %s1250_s21 = smov %s937_s22 }
 0x246   : > { %s1251_s22 = smov %s1253_s26  ;;  %24 = sbr.rel (!%p22_p1) target bundleno = 8 (0x8), region = 101 }
 0x24d   :  { %565 = vsyncpa [#allocation4], 1 }
 0x24e   :  { %567 = vsyncpa [#allocation4 + $0x1], 1 }
 0x24f   :  { %568 = vsyncpa [#allocation5], 1 }
 0x250   :  { %570 = vsyncpa [#allocation5 + $0x1], 1 }
 0x251   :  { %571 = vsyncpa [#allocation8], 1 }
 0x252   :  { %573 = vsyncpa [#allocation8 + $0x1], 1 }

</bundles_post_ra>
